<compile_context>
chip_gen: v5e
topology: v5e:2x2
jax: 0.10.0
libtpu: 0.0.40
codegen_flags: <defaults>
</compile_context>

<pallas_src>
import jax
import jax.numpy as jnp
from jax.experimental import pallas as pl
from jax.experimental.pallas import tpu as pltpu


def _round_up(x: int, m: int) -> int:
    return (x + m - 1) // m * m


def textclf_kernel(text_ref, bag_ref,                      # scalar prefetch (SMEM)
                   row_ref, wt_ref, bias_ref, counts_ref,  # inputs (VMEM)
                   out_ref,                                # output (VMEM)
                   acc_ref):                               # scratch (VMEM)
    """Grid = (T,): one gathered embedding row per step.

    row_ref   : (1, 1, D_pad)  E[text[t]], gathered via data-dependent index_map
    wt_ref    : (D_pad, C_pad) fc weight (transposed, zero-padded), grid-resident
    bias_ref  : (1, C_pad)     fc bias (zero-padded), grid-resident
    counts_ref: (B_pad, 1)     tokens per bag (f32), grid-resident
    out_ref   : (B_pad, C_pad) logits, written once at the final step
    acc_ref   : (B_pad, D_pad) f32 per-bag sum accumulator (persists across grid)
    """
    t = pl.program_id(0)

    @pl.when(t == 0)
    def _init():
        acc_ref[...] = jnp.zeros_like(acc_ref)

    # Scatter-add this token's embedding row into its bag's accumulator row.
    # (B_pad is tiny, so a one-hot select over bag rows is cheaper/safer than a
    #  dynamic sublane store.)
    b = bag_ref[t]
    bag_iota = jax.lax.broadcasted_iota(jnp.int32, (acc_ref.shape[0], 1), 0)
    onehot = jnp.where(bag_iota == b, 1.0, 0.0)            # (B_pad, 1)
    acc_ref[...] = acc_ref[...] + onehot * row_ref[0]      # (B_pad,1)*(1,D_pad)

    @pl.when(t == pl.num_programs(0) - 1)
    def _finalize():
        # EmbeddingBag mean: divide by bag size (empty bags -> zeros).
        inv = pl.reciprocal(jnp.maximum(counts_ref[...], 1.0), approx=False)
        mean = acc_ref[...] * inv                          # (B_pad, D_pad)
        logits = jnp.dot(mean, wt_ref[...],
                         preferred_element_type=jnp.float32) + bias_ref[...]
        out_ref[...] = logits.astype(out_ref.dtype)


def text_classification_forward(text, offsets, emb_table, fc_weight, fc_bias):
    """Replicates TextClassificationModel.forward(text, offsets).

    text:      (T,)  int32 token ids
    offsets:   (B,)  int32 bag start offsets (offsets[0] == 0, sorted)
    emb_table: (V, D) f32
    fc_weight: (C, D) f32   (PyTorch nn.Linear layout)
    fc_bias:   (C,)   f32
    returns:   (B, C) f32 logits
    """
    V, D = emb_table.shape
    C = fc_weight.shape[0]
    T = text.shape[0]
    B = offsets.shape[0]

    D_pad = _round_up(D, 128)   # lane-align the embedding / matmul K dim
    C_pad = _round_up(C, 128)   # lane-dense output (avoids masked vst.msk)
    B_pad = _round_up(B, 8)     # sublane-align the batch dim

    text = text.astype(jnp.int32)
    offsets = offsets.astype(jnp.int32)

    # bag id of each token: O(T log B) searchsorted instead of a (T, B) matrix.
    token_pos = jnp.arange(T, dtype=jnp.int32)
    bag_ids = (jnp.searchsorted(offsets, token_pos, side="right") - 1).astype(jnp.int32)

    # tokens per bag (for the mean); padded rows / empty bags stay 0.
    counts = jnp.zeros((B_pad,), jnp.float32).at[bag_ids].add(1.0).reshape(B_pad, 1)

    # Zero-pad operands to TPU-friendly shapes (padding keeps the math exact).
    emb_p = jnp.zeros((V, 1, D_pad), jnp.float32).at[:, 0, :D].set(emb_table)
    wt_p = jnp.zeros((D_pad, C_pad), jnp.float32).at[:D, :C].set(fc_weight.T)
    bias_p = jnp.zeros((1, C_pad), jnp.float32).at[0, :C].set(fc_bias)

    grid_spec = pltpu.PrefetchScalarGridSpec(
        num_scalar_prefetch=2,           # text, bag_ids -> SMEM, fed to index_maps
        grid=(T,),
        in_specs=[
            # Gather E[text[t]]: data-dependent block index on the vocab axis.
            pl.BlockSpec((1, 1, D_pad), lambda t, text_ref, bag_ref: (text_ref[t], 0, 0)),
            # Tiny projection operands stay resident across the whole grid.
            pl.BlockSpec((D_pad, C_pad), lambda t, text_ref, bag_ref: (0, 0)),
            pl.BlockSpec((1, C_pad), lambda t, text_ref, bag_ref: (0, 0)),
            pl.BlockSpec((B_pad, 1), lambda t, text_ref, bag_ref: (0, 0)),
        ],
        out_specs=pl.BlockSpec((B_pad, C_pad), lambda t, text_ref, bag_ref: (0, 0)),
        scratch_shapes=[pltpu.VMEM((B_pad, D_pad), jnp.float32)],
    )

    cost = pl.CostEstimate(
        flops=2 * T * B_pad * D_pad + 2 * B_pad * D_pad * C_pad,
        transcendentals=0,
        bytes_accessed=(T * D_pad + D_pad * C_pad + 1 * C_pad
                        + B_pad * 1 + B_pad * C_pad) * 4 + T * 2 * 4,
    )

    out = pl.pallas_call(
        textclf_kernel,
        out_shape=jax.ShapeDtypeStruct((B_pad, C_pad), jnp.float32),
        grid_spec=grid_spec,
        compiler_params=pltpu.CompilerParams(
            # token axis carries the accumulator -> must be sequential
            dimension_semantics=("arbitrary",)),
        cost_estimate=cost,
    )(text, bag_ids, emb_p, wt_p, bias_p, counts)

    return out[:B, :C]


if __name__ == "__main__":
    # Small, forward-consistent shapes.
    vocab_size = 50
    embed_dim = 32
    num_class = 4
    batch = 4

    key = jax.random.PRNGKey(0)
    k_emb, k_fc, k_txt = jax.random.split(key, 3)

    # Deterministic init matching init_weights(): uniform(-0.5, 0.5), bias = 0.
    initrange = 0.5
    emb_table = jax.random.uniform(k_emb, (vocab_size, embed_dim),
                                   jnp.float32, -initrange, initrange)
    fc_weight = jax.random.uniform(k_fc, (num_class, embed_dim),
                                   jnp.float32, -initrange, initrange)
    fc_bias = jnp.zeros((num_class,), jnp.float32)

    # Flat token stream + bag offsets (variable-length bags).
    bag_lengths = [3, 5, 4, 4]
    total_tokens = sum(bag_lengths)
    text = jax.random.randint(k_txt, (total_tokens,), 0, vocab_size, jnp.int32)
    offsets = jnp.array([0, 3, 8, 12], jnp.int32)

    logits = text_classification_forward(text, offsets, emb_table, fc_weight, fc_bias)
    logits = jax.block_until_ready(logits)

    # Pure-JAX reference (EmbeddingBag mean + Linear) for sanity checking.
    def ref_forward(text, offsets, emb, w, b):
        gathered = emb[text]                                  # (T, D)
        ends = jnp.concatenate([offsets[1:], jnp.array([text.shape[0]], jnp.int32)])
        rows = []
        for i in range(offsets.shape[0]):
            s, e = int(offsets[i]), int(ends[i])
            rows.append(jnp.mean(gathered[s:e], axis=0))
        embedded = jnp.stack(rows)                            # (B, D)
        return embedded @ w.T + b

    ref = ref_forward(text, offsets, emb_table, fc_weight, fc_bias)
    assert logits.shape == (batch, num_class)
    assert jnp.allclose(logits, ref, atol=1e-5, rtol=1e-4)

    print("KERNEL_OK")
</pallas_src>

<mosaic_0001>
module attributes {stable_mosaic.version = 11 : i64} {
  func.func @textclf_kernel(%arg0: i32, %arg1: memref<16xi32, #tpu.memory_space<smem>>, %arg2: memref<16xi32, #tpu.memory_space<smem>>, %arg3: memref<1x1x128xf32, #tpu.memory_space<vmem>>, %arg4: memref<128x128xf32, #tpu.memory_space<vmem>>, %arg5: memref<1x128xf32, #tpu.memory_space<vmem>>, %arg6: memref<8x1xf32, #tpu.memory_space<vmem>>, %arg7: memref<8x128xf32, #tpu.memory_space<vmem>>, %arg8: memref<8x128xf32, #tpu.memory_space<vmem>>) attributes {dimension_semantics = [#tpu.dimension_semantics<arbitrary>], iteration_bounds = array<i64: 16>, scalar_prefetch = 2 : i64, scratch_operands = 1 : i64, tpu.core_type = #tpu.core_type<tc>, window_params = [{transform_indices = @transform_0, window_bounds = array<i64: 1, 1, 128>}, {pipeline_mode = #tpu.pipeline_mode<synchronous>, transform_indices = @transform_1, window_bounds = array<i64: 128, 128>}, {pipeline_mode = #tpu.pipeline_mode<synchronous>, transform_indices = @transform_2, window_bounds = array<i64: 1, 128>}, {pipeline_mode = #tpu.pipeline_mode<synchronous>, transform_indices = @transform_3, window_bounds = array<i64: 8, 1>}, {pipeline_mode = #tpu.pipeline_mode<synchronous>, transform_indices = @transform_4, window_bounds = array<i64: 8, 128>}]} {
    %c0_i32 = arith.constant 0 : i32
    %0 = arith.cmpi eq, %arg0, %c0_i32 : i32
    %1 = arith.extui %0 : i1 to i32
    %c0_i32_0 = arith.constant 0 : i32
    %2 = arith.cmpi ne, %1, %c0_i32_0 : i32
    scf.if %2 {
      %cst_9 = arith.constant 0.000000e+00 : f32
      %22 = vector.broadcast %cst_9 : f32 to vector<8x128xf32>
      %c0_10 = arith.constant 0 : index
      %c0_11 = arith.constant 0 : index
      %23 = vector.load %arg8[%c0_10, %c0_11] : memref<8x128xf32, #tpu.memory_space<vmem>>, vector<8x128xf32>
      tpu.vector_store %arg8[%c0_10, %c0_11], %22 {strides = array<i32>} : memref<8x128xf32, #tpu.memory_space<vmem>>, vector<8x128xf32>,
    } else {
    }
    %3 = arith.index_cast %arg0 : i32 to index
    %4 = memref.load %arg2[%3] : memref<16xi32, #tpu.memory_space<smem>>
    %5 = tpu.iota {dimensions = array<i32: 0>} : vector<8x1xi32>
    %6 = vector.broadcast %4 : i32 to vector<8x1xi32>
    %7 = arith.cmpi eq, %5, %6 : vector<8x1xi32>
    %cst = arith.constant 1.000000e+00 : f32
    %cst_1 = arith.constant 0.000000e+00 : f32
    %8 = vector.broadcast %cst : f32 to vector<8x1xf32>
    %9 = vector.broadcast %cst_1 : f32 to vector<8x1xf32>
    %10 = arith.select %7, %8, %9 : vector<8x1xi1>, vector<8x1xf32>
    %c0 = arith.constant 0 : index
    %c0_2 = arith.constant 0 : index
    %11 = vector.load %arg8[%c0, %c0_2] : memref<8x128xf32, #tpu.memory_space<vmem>>, vector<8x128xf32>
    %c0_3 = arith.constant 0 : index
    %c0_4 = arith.constant 0 : index
    %c0_5 = arith.constant 0 : index
    %12 = vector.load %arg3[%c0_3, %c0_4, %c0_5] : memref<1x1x128xf32, #tpu.memory_space<vmem>>, vector<1x1x128xf32>
    %13 = vector.shape_cast %12 : vector<1x1x128xf32> to vector<1x128xf32>
    %14 = vector.broadcast %10 : vector<8x1xf32> to vector<8x128xf32>
    %15 = vector.broadcast %13 : vector<1x128xf32> to vector<8x128xf32>
    %16 = arith.mulf %14, %15 : vector<8x128xf32>
    %17 = arith.addf %11, %16 : vector<8x128xf32>
    %c0_6 = arith.constant 0 : index
    %c0_7 = arith.constant 0 : index
    %18 = vector.load %arg8[%c0_6, %c0_7] : memref<8x128xf32, #tpu.memory_space<vmem>>, vector<8x128xf32>
    tpu.vector_store %arg8[%c0_6, %c0_7], %17 {strides = array<i32>} : memref<8x128xf32, #tpu.memory_space<vmem>>, vector<8x128xf32>,
    %c15_i32 = arith.constant 15 : i32
    %19 = arith.cmpi eq, %arg0, %c15_i32 : i32
    %20 = arith.extui %19 : i1 to i32
    %c0_i32_8 = arith.constant 0 : i32
    %21 = arith.cmpi ne, %20, %c0_i32_8 : i32
    scf.if %21 {
      %c0_9 = arith.constant 0 : index
      %c0_10 = arith.constant 0 : index
      %22 = vector.load %arg6[%c0_9, %c0_10] : memref<8x1xf32, #tpu.memory_space<vmem>>, vector<8x1xf32>
      %cst_11 = arith.constant 1.000000e+00 : f32
      %23 = vector.broadcast %cst_11 : f32 to vector<8x1xf32>
      %24 = arith.maximumf %22, %23 : vector<8x1xf32>
      %25 = tpu.reciprocal %24 : vector<8x1xf32> -> vector<8x1xf32>
      %c0_12 = arith.constant 0 : index
      %c0_13 = arith.constant 0 : index
      %26 = vector.load %arg8[%c0_12, %c0_13] : memref<8x128xf32, #tpu.memory_space<vmem>>, vector<8x128xf32>
      %27 = vector.broadcast %25 : vector<8x1xf32> to vector<8x128xf32>
      %28 = arith.mulf %26, %27 : vector<8x128xf32>
      %c0_14 = arith.constant 0 : index
      %c0_15 = arith.constant 0 : index
      %29 = vector.load %arg4[%c0_14, %c0_15] : memref<128x128xf32, #tpu.memory_space<vmem>>, vector<128x128xf32>
      %cst_16 = arith.constant dense<0.000000e+00> : vector<8x128xf32>
      %30 = tpu.matmul %28, %29, %cst_16 {dimension_numbers = #tpu.dot_dimension_numbers<[1], [0], [0], [1], [0, 0, 1, 1], [], []>} : vector<8x128xf32>, vector<128x128xf32>, vector<8x128xf32> -> vector<8x128xf32>
      %c0_17 = arith.constant 0 : index
      %c0_18 = arith.constant 0 : index
      %31 = vector.load %arg5[%c0_17, %c0_18] : memref<1x128xf32, #tpu.memory_space<vmem>>, vector<1x128xf32>
      %32 = vector.broadcast %31 : vector<1x128xf32> to vector<8x128xf32>
      %33 = arith.addf %30, %32 : vector<8x128xf32>
      %c0_19 = arith.constant 0 : index
      %c0_20 = arith.constant 0 : index
      %34 = vector.load %arg7[%c0_19, %c0_20] : memref<8x128xf32, #tpu.memory_space<vmem>>, vector<8x128xf32>
      tpu.vector_store %arg7[%c0_19, %c0_20], %33 {strides = array<i32>} : memref<8x128xf32, #tpu.memory_space<vmem>>, vector<8x128xf32>,
    } else {
    }
    return
  }
  func.func @transform_0(%arg0: i32, %arg1: memref<16xi32, #tpu.memory_space<smem>>, %arg2: memref<16xi32, #tpu.memory_space<smem>>) -> (i32, i32, i32) {
    %0 = arith.index_cast %arg0 : i32 to index
    %1 = memref.load %arg1[%0] : memref<16xi32, #tpu.memory_space<smem>>
    %c0_i32 = arith.constant 0 : i32
    %c0_i32_0 = arith.constant 0 : i32
    %c0_i32_1 = arith.constant 0 : i32
    return %1, %c0_i32, %c0_i32_0 : i32, i32, i32
  }
  func.func @transform_1(%arg0: i32, %arg1: memref<16xi32, #tpu.memory_space<smem>>, %arg2: memref<16xi32, #tpu.memory_space<smem>>) -> (i32, i32) {
    %c0_i32 = arith.constant 0 : i32
    %c0_i32_0 = arith.constant 0 : i32
    %c0_i32_1 = arith.constant 0 : i32
    return %c0_i32, %c0_i32_0 : i32, i32
  }
  func.func @transform_2(%arg0: i32, %arg1: memref<16xi32, #tpu.memory_space<smem>>, %arg2: memref<16xi32, #tpu.memory_space<smem>>) -> (i32, i32) {
    %c0_i32 = arith.constant 0 : i32
    %c0_i32_0 = arith.constant 0 : i32
    %c0_i32_1 = arith.constant 0 : i32
    return %c0_i32, %c0_i32_0 : i32, i32
  }
  func.func @transform_3(%arg0: i32, %arg1: memref<16xi32, #tpu.memory_space<smem>>, %arg2: memref<16xi32, #tpu.memory_space<smem>>) -> (i32, i32) {
    %c0_i32 = arith.constant 0 : i32
    %c0_i32_0 = arith.constant 0 : i32
    %c0_i32_1 = arith.constant 0 : i32
    return %c0_i32, %c0_i32_0 : i32, i32
  }
  func.func @transform_4(%arg0: i32, %arg1: memref<16xi32, #tpu.memory_space<smem>>, %arg2: memref<16xi32, #tpu.memory_space<smem>>) -> (i32, i32) {
    %c0_i32 = arith.constant 0 : i32
    %c0_i32_0 = arith.constant 0 : i32
    %c0_i32_1 = arith.constant 0 : i32
    return %c0_i32, %c0_i32_0 : i32, i32
  }
}

</mosaic_0001>

<bundles_post_ra>
// kernel: tpu_custom_call.1
= control target key start
LH: loop header
LB: loop body
LE: loop exit
PB: predicated region body
PF: predicated region fallthrough
CT: control target
= control target key end

     0   :  { %s630_s27 = smov [#allocation4]   ;;  %s631_s28 = smov [#allocation5]   ;;  %s793_s0 = inlined_call_operand.vmem [shape: s32[16], index: 0, kind: input, shape index: {}]   ;;  %s794_s2 = inlined_call_operand.hbm [shape: f32[50,1,128], index: 2, kind: input, shape index: {}]   ;;  %s795_s3 = inlined_call_operand.hbm [shape: f32[128,128], index: 3, kind: input, shape index: {}]   ;;  %s796_s4 = inlined_call_operand.vmem [shape: f32[1,128], index: 4, kind: input, shape index: {}]   ;;  %s797_s5 = inlined_call_operand.vmem [shape: f32[8,1], index: 5, kind: input, shape index: {}]   ;;  %s798_s6 = inlined_call_operand.hbm [shape: f32[8,128], index: 6, kind: output, shape index: {}]   ;;  %s799_s1 = inlined_call_operand.vmem [shape: s32[16], index: 1, kind: input, shape index: {}]  }
   0x1   :  { %s12_s23 = sshll.u32 %s793_s0, 4  ;;  %s17_s26 = sshll.u32 %s799_s1, 4  ;;  %s13_s23 = int_to_ptr.vmem [resolvable:$true] %s12_s23  ;;  %s18_s26 = int_to_ptr.vmem [resolvable:$true] %s17_s26 }
   0x2   :  { %15 = dma.vmem_to_smem %s13_s23, 16, %s630_s27, [#allocation3] }
   0x3   :  { %20 = dma.vmem_to_smem %s18_s26, 16, %s631_s28, [#allocation3] }
   0x4   :  { %600 = dma.done.wait [#allocation3], 32 }
   0x5   :  { %601 = vsyncadd [#allocation3], 4294967264 }
   0x6   :  { %23 = sfence }
   0x7   :  { %24 = vsyncpa [#allocation7], 0 }
   0x8   :  { %26 = vsyncpa [#allocation7 + $0x1], 0 }
   0x9   :  { %27 = vsyncpa [#allocation10], 0 }
   0xa   :  { %28 = vsyncpa [#allocation8], 0  ;;  %s680_s29 = smov 0   ;;  %s682_s0 = smov 0  }
   0xb   :  { %s684_s30 = smov 0   ;;  %s686_s1 = smov 0  }
   0xc LB: > { %s162_s9 = sshll.u32 %s795_s3, 4  ;;  %s702_s10 = sadd.s32 4294967295, %s628_s1   ;;  %s628_s1 = sphi %s686_s1, %s806_s1   ;;  %s624_s30 = sphi %s684_s30, %s805_s30   ;;  %s620_s0 = sphi %s682_s0, %s804_s0   ;;  %s616_s29 = sphi %s680_s29, %s803_s29   ;;  %s163_s9 = int_to_ptr.hbm [resolvable:$true] %s162_s9 }
   0xd   : > { %p388_p0 = scmp.ge.s32.totalorder %s628_s1, 1  ;;  %p57_p1 = scmp.eq.s32.totalorder %s702_s10, 0 }
   0xe   : > { %p151_p2 = scmp.lt.s32.totalorder %s628_s1, 17  ;;  %p389_p3 = scmp.ne.s32.totalorder %s702_s10, 0 }
   0xf   : > { %s632_s12 = smov [#allocation9]   ;;  %s633_s14 = smov 128  }
  0x10   : > { %p708_p4 = pnand %p388_p0, %p151_p2  ;;  %s164_s13 = sshll.u32 %s632_s12, 4  ;;  %s165_s13 = int_to_ptr.vmem [resolvable:$true] %s164_s13 }
  0x11   : > { %s634_s15 = smov 8   ;;  %s717_s16 = sadd.s32 1, %s628_s1  }
  0x12   : > { %p411_p5 = pneg %p708_p4  ;;  %s38_s17 = sld [smem:[#allocation4 + %s628_s1]] }
  0x13   : > { %s39_s18 = sld [smem:[#allocation4 + %s717_s16]]  ;;  %p50_p7 = scmp.ne.s32.totalorder %s624_s30, %s620_s0 }
  0x14   : > { %p412_p6 = pnand %p411_p5, %p57_p1  ;;  %p51_p8 = scmp.eq.s32.totalorder %s628_s1, 0 }
  0x15   : > { %p56_p9 = scmp.ne.s32.totalorder %s620_s0, %s616_s29  ;;  %s43_s20 = sadd.s32 1, %s624_s30 }
  0x16   : > { %414 = dma.hbm_to_vmem [thread:$0]  (!%p412_p6), %s163_s9, 2048, %s165_s13, [#allocation10], %s633_s14, %s633_s14, %s634_s15  }
  0x17   : > { %p52_p10 = por %p51_p8, %p50_p7  ;;  %p727_p11 = por %p57_p1, %p56_p9 }
  0x18   : > { %p422_p12 = scmp.lt.s32.totalorder %s628_s1, 16  ;;  %s184_s23 = sand.u32 1, %s624_s30  }
  0x19   : > { %s401_s21 = scalar_select %p52_p10, [#allocation4], [#allocation12] }
  0x1a   : > { %s40_s22 = ssub.s32 %s38_s17, %s39_s18  ;;  %s808_s1 = smov (!%p52_p10, %s628_s1), 0 }
  0x1b   : > { %p41_p13 = scmp.eq.s32.totalorder %s40_s22, 0  ;;  %s810_s21 = smov (!%p422_p12, %s401_s21), [#allocation13] }
  0x1c   : > { %s812_s1 = smov (!%p422_p12, %s808_s1), 0  ;;  %p738_p0 = pnand %p422_p12, %p52_p10 }
  0x1d   : > { %s736_s24 = scalar_select %p41_p13, %s624_s30, %s43_s20  }
  0x1e   : > { %s188_s26 = sld [smem:[%s810_s21 + %s812_s1]]  ;;  %s187_s27 = scalar_lea.vmem [#allocation6], %s184_s23 }
  0x1f   : > { %s195_s28 = sshll.u32 %s187_s27, 4  ;;  %s185_s12 = scalar_lea.sflag [#allocation7], %s184_s23  ;;  %s196_s28 = int_to_ptr.vmem [resolvable:$true] %s195_s28 }
  0x20   : > { %p530_p5 = pneg %p738_p0  ;;  %s533_s17 = scalar_lea.hbm %s794_s2, 50 }
  0x24   : > { %s191_s8 = scalar_lea.hbm %s794_s2, %s188_s26 }
  0x25   : > { %s193_s9 = sshll.u32 %s191_s8, 4  ;;  %s194_s9 = int_to_ptr.hbm [resolvable:$true] %s193_s9 }
  0x26   : > { %s526_s13 = sshra.s32 %s194_s9, 4  ;;  %s527_s13 = int_to_ptr.hbm [resolvable:$true] %s526_s13 }
  0x27   : > { %s528_s14 = scalar_lea.hbm %s527_s13, 1  ;;  %p534_p8 = scmp.lt.s32.totalorder %s527_s13, %s794_s2 }
  0x28   : > { %p529_p2 = scmp.ne.s32.totalorder %s527_s13, %s528_s14  ;;  %p535_p9 = scmp.lt.s32.totalorder %s533_s17, %s528_s14 }
  0x2a   : > { %p531_p6 = pnand %p530_p5, %p529_p2  ;;  %p536_p10 = por %p535_p9, %p534_p8 }
  0x2c   : > { %p532_p7 = pneg %p531_p6 }
  0x2e   : > { %p537_p12 = pnand %p536_p10, %p532_p7 }
  0x30   : > { %540 = shalt.err (!%p537_p12)
}
  0x31   : > { %420 = dma.hbm_to_vmem [thread:$0]  (!%p738_p0), %s194_s9, 16, %s196_s28, %s185_s12  }
  0x32   : > { %204 = sbr.rel (%p708_p4) target bundleno = 350 (0x15e), region = 36  ;;  %s206_s21 = sand.u32 (!%p708_p4), 1, %s620_s0  }
  0x33   : > { %s207_s22 = scalar_lea.sflag (!%p708_p4), [#allocation7], %s206_s21  ;;  %s209_s23 = scalar_lea.vmem (!%p708_p4), [#allocation6], %s206_s21 }
  0x37   : > { %603 = dma.done.wait (%p727_p11), %s207_s22, 16  }
  0x38   : > { %605 = vsyncadd (%p727_p11), %s207_s22, 4294967280 }
  0x39   : > { %607 = dma.done.wait (%p57_p1), [#allocation10], 2048  }
  0x3a   : > { %609 = vsyncadd (%p57_p1), [#allocation10], 4294965248  ;;  %238 = sbr.rel (%p389_p3) target bundleno = 65 (0x41), region = 48 }
  0x3f   : > { %v635_v0 = vmov 0.0  }
  0x40   : > { %239 = vst [vmem:[#allocation2] sm:$0xff] %v635_v0 }
  0x41 PF: > { %s240_s11 = sld [smem:[#allocation5 + %s702_s10]]  ;;  %v241_v1 = vlaneseq  ;;  %v467_v3 = vld [vmem:[%s209_s23] ss:$0 sm:$0xff]  ;;  %v636_v5 = vmov 0.0   ;;  %p394_p1 = scmp.ne.s32.totalorder %s702_s10, 15 }
  0x43   : > { %v242_v2 = vshrl.u32 %v241_v1, 7 }
  0x47   : > { %v243_v4 = vstv %s240_s11  ;;  %v246_v7 = vld [vmem:[#allocation2] sm:$0xff] }
  0x48   : > { %vm244_vm0 = vcmp.eq.s32.totalorder %v242_v2, %v243_v4 }
  0x49   : > { %v245_v6 = vsel %vm244_vm0, 1.0, %v636_v5 }
  0x4a   : > { %v251_v8 = vmul.f32 %v467_v3, %v245_v6  ;;  %257 = sbr.rel (%p394_p1) target bundleno = 345 (0x159), region = 52 }
  0x4c   : > { %v252_v9 = vadd.f32 %v251_v8, %v246_v7 }
  0x4e   : > { %253 = vst [vmem:[#allocation2] sm:$0xff] %v252_v9 }
  0x4f   : > { %v258_v10 = vld [vmem:[%s797_s5] sm:$0xff]  ;;  %v637_v13 = vmov 0   ;;  %v294_v15 = vld [vmem:[#allocation9 + $0x68] sm:$0xff]  ;;  %v293_v16 = vld [vmem:[#allocation9 + $0x60] sm:$0xff] }
  0x50   : > { %v296_v11 = vld [vmem:[#allocation9 + $0x78] sm:$0xff]  ;;  %v295_v12 = vld [vmem:[#allocation9 + $0x70] sm:$0xff]  ;;  %468 = vset.pattern.permute.xlu0 %v637_v13  ;;  %v259_v14 = vmax.f32 %v258_v10, 1.0  ;;  %v290_v21 = vld [vmem:[#allocation9 + $0x48] sm:$0xff] }
  0x51   : > { %301 = vmatpush.msra.mxu0 %v296_v11  ;;  %v292_v17 = vld [vmem:[#allocation9 + $0x58] sm:$0xff]  ;;  %v291_v18 = vld [vmem:[#allocation9 + $0x50] sm:$0xff]  ;;  %v289_v25 = vld [vmem:[#allocation9 + $0x40] sm:$0xff] }
  0x52   : > { %470 = vrcp.f32 %v259_v14  ;;  %v271_v22 = vand.u32 2147483648, %v259_v14  ;;  %vm265_vm1 = vweird.f32 %v259_v14  ;;  %v269_v24 = vand.u32 2147483647, %v259_v14  ;;  %v288_v27 = vld [vmem:[#allocation9 + $0x38] sm:$0xff]  ;;  %v287_v30 = vld [vmem:[#allocation9 + $0x30] sm:$0xff]  ;;  %v286_v32 = vld [vmem:[#allocation9 + $0x28] sm:$0xff] }
  0x53   : > { %302 = vmatpush.msra.mxu0 %v295_v12  ;;  %v285_v34 = vld [vmem:[#allocation9 + $0x20] sm:$0xff]  ;;  %v284_v35 = vld [vmem:[#allocation9 + $0x18] sm:$0xff]  ;;  %v283_v36 = vld [vmem:[#allocation9 + $0x10] sm:$0xff] }
  0x54   : > { %v272_v28 = vor.u32 1.1754944e-38, %v271_v22  ;;  %vm270_vm4 = vcmp.eq.f32.partialorder %v269_v24, 8.507059e+37  ;;  %v282_v37 = vld [vmem:[#allocation9 + $0x8] sm:$0xff]  ;;  %v281_v38 = vld [vmem:[#allocation9] sm:$0xff]  ;;  %v469_v42 = vld [vmem:[%s796_s4] ss:$0 sm:$0xff] }
  0x55   : > { %303 = vmatpush.msra.mxu0 %v294_v15  ;;  %v274_v39 = vld [vmem:[#allocation2] sm:$0xff] }
  0x57   : > { %304 = vmatpush.msra.mxu0 %v293_v16 }
  0x58   : > { %v471_v19 = vpop.eup %470 }
  0x59   : > { %305 = vmatpush.msra.mxu0 %v292_v17  ;;  %v261_v20 = vmul.f32 %v471_v19, %v259_v14  ;;  %vm266_vm2 = vweird.f32 %v471_v19 }
  0x5a   : > { %vm267_vm3 = vmor %vm265_vm1, %vm266_vm2 }
  0x5b   : > { %306 = vmatpush.msra.mxu0 %v291_v18  ;;  %v262_v23 = vsub.f32 1.0, %v261_v20 }
  0x5d   : > { %307 = vmatpush.msra.mxu0 %v290_v21  ;;  %v263_v26 = vmul.f32 %v471_v19, %v262_v23 }
  0x5f   : > { %308 = vmatpush.msra.mxu0 %v289_v25  ;;  %v264_v29 = vadd.f32 %v471_v19, %v263_v26 }
  0x61   : > { %309 = vmatpush.msra.mxu0 %v288_v27  ;;  %v268_v31 = vsel %vm267_vm3, %v471_v19, %v264_v29 }
  0x62   : > { %v273_v33 = vsel %vm270_vm4, %v272_v28, %v268_v31 }
  0x63   : > { %310 = vmatpush.msra.mxu0 %v287_v30  ;;  %277 = vperm.xlu0 %468, %v273_v33  }
  0x65   : > { %311 = vmatpush.msra.mxu0 %v286_v32 }
  0x67   : > { %312 = vmatpush.msra.mxu0 %v285_v34 }
  0x69   : > { %313 = vmatpush.msra.mxu0 %v284_v35 }
  0x6b   : > { %314 = vmatpush.msra.mxu0 %v283_v36 }
  0x6d   : > { %315 = vmatpush.msra.mxu0 %v282_v37 }
  0x6f   : > { %316 = vmatpush.msra.mxu0 %v281_v38 }
  0xd5   : > { %v278_v40 = vpop.permute.xlu0 %277 }
  0xd6   : > { %v280_v41 = vmul.f32 %v278_v40, %v274_v39 }
  0xd8   : > { %317 = vmatmul.f32.vlgmr.msra.gmra.mxu0 %v280_v41 }
 0x155   : > { %v318_v43 = vpop.f32.mrf.mxu0 }
 0x156   : > { %v319_v44 = vadd.f32 %v469_v42, %v318_v43 }
 0x158   : > { %321 = vst [vmem:[#allocation11] sm:$0xff] %v319_v44 }
 0x159 PF: > { %p424_p3 = scmp.eq.s32.totalorder %s702_s10, 15  ;;  %s638_s28 = smov [#allocation11]  }
 0x15a   : > { %s328_s29 = sshll.u32 %s638_s28, 4  ;;  %s330_s9 = sshll.u32 %s798_s6, 4  ;;  %s329_s29 = int_to_ptr.vmem [resolvable:$true] %s328_s29  ;;  %s331_s9 = int_to_ptr.hbm [resolvable:$true] %s330_s9 }
 0x15b   : > { %408 = dma.vmem_to_hbm [thread:$0]  (%p424_p3), %s329_s29, 128, %s331_s9, [#allocation8]  }
 0x15c   : > { %611 = dma.done.wait (%p424_p3), [#allocation8], 128  }
 0x15d   : > { %613 = vsyncadd (%p424_p3), [#allocation8], 4294967168 }
 0x15e PF: > { %p31_p4 = scmp.ge.s32.totalorder %s717_s16, 18   ;;  %s803_s29 = smov %s620_s0 }
 0x15f   : > { %s804_s0 = smov %s624_s30  ;;  %s805_s30 = smov %s736_s24 }
 0x160   : > { %s806_s1 = smov %s717_s16  ;;  %33 = sbr.rel (!%p31_p4) target bundleno = 12 (0xc), region = 85 }
 0x165   :  { %344 = vsyncpa [#allocation7], 1 }
 0x166   :  { %346 = vsyncpa [#allocation7 + $0x1], 1 }
 0x167   :  { %347 = vsyncpa [#allocation10], 1 }
 0x168   :  { %348 = vsyncpa [#allocation8], 1 }
 0x169   :  { %350 = vsyncpa [#allocation8 + $0x1], 1 }

</bundles_post_ra>
